<compile_context>
chip_gen: v6e
topology: v6e:2x2x1
jax: 0.10.0
libtpu: 0.0.40
codegen_flags: <defaults>
</compile_context>

<pallas_src>
import math

import jax
import jax.numpy as jnp
from jax.experimental import pallas as pl
from jax.experimental.pallas import tpu as pltpu


SENT = -1e6        # sentinel column coordinate -> tent weight exactly 0 (padding_mode='zeros')
COORD_CLIP = 1e4   # sampling coords clipped to +/- this; |SENT| >> COORD_CLIP + 1


# ---------------------------------------------------------------------------
# Reference points (pure-JAX glue, mirrors DeformableTransformerEncoder.get_reference_points)
# ---------------------------------------------------------------------------
def get_reference_points(spatial_shapes, valid_ratios):
    ref_list = []
    for lvl, (H, W) in enumerate(spatial_shapes):
        ref_y, ref_x = jnp.meshgrid(
            jnp.linspace(0.5, H - 0.5, H, dtype=jnp.float32),
            jnp.linspace(0.5, W - 0.5, W, dtype=jnp.float32),
            indexing="ij",
        )
        ref_y = ref_y.reshape(-1)[None] / (valid_ratios[:, None, lvl, 1] * H)
        ref_x = ref_x.reshape(-1)[None] / (valid_ratios[:, None, lvl, 0] * W)
        ref_list.append(jnp.stack((ref_x, ref_y), -1))
    reference_points = jnp.concatenate(ref_list, 1)                          # (B, L, 2)
    reference_points = reference_points[:, :, None] * valid_ratios[:, None]  # (B, L, Lv, 2)
    return reference_points


def make_ref_pix(reference_points, spatial_shapes, P):
    """(B, L, Lv, 2) -> (B, L, 2*Lv*P) pixel-space bases: [x*W-0.5 | y*H-0.5], P copies/level."""
    parts_x, parts_y = [], []
    for l, (H, W) in enumerate(spatial_shapes):
        bx = reference_points[:, :, l, 0] * float(W) - 0.5
        by = reference_points[:, :, l, 1] * float(H) - 0.5
        parts_x.append(jnp.repeat(bx[..., None], P, axis=-1))
        parts_y.append(jnp.repeat(by[..., None], P, axis=-1))
    return jnp.concatenate(parts_x + parts_y, axis=-1).astype(jnp.float32)


def make_col_maps(spatial_shapes, L_pad):
    """Grid-invariant (2*Lv, L_pad) f32 column-coordinate maps over the padded global token
    axis: rows [x_lvl0..x_lvlN | y_lvl0..y_lvlN]; out-of-level / pad columns get SENT."""
    rows_x, rows_y = [], []
    start = 0
    for (H, W) in spatial_shapes:
        idx = jnp.arange(L_pad, dtype=jnp.int32) - start
        yq = jnp.floor_divide(idx, W)
        xq = idx - yq * W
        in_lvl = (idx >= 0) & (idx < H * W)
        rows_x.append(jnp.where(in_lvl, xq.astype(jnp.float32), SENT))
        rows_y.append(jnp.where(in_lvl, yq.astype(jnp.float32), SENT))
        start += H * W
    return jnp.stack(rows_x + rows_y, axis=0)


# ---------------------------------------------------------------------------
# Pallas kernels for one encoder layer
# ---------------------------------------------------------------------------
def make_layer_kernels(spatial_shapes, D, M, P, TQ, cdt):
    Lv = len(spatial_shapes)
    LvP = Lv * P
    MLvP = M * LvP
    L = sum(h * w for h, w in spatial_shapes)
    L_pad = ((L + 127) // 128) * 128
    EPS = 1e-5
    exact = (jnp.dtype(cdt) == jnp.dtype(jnp.float32))

    def layernorm(x, g, b):
        mu = jnp.mean(x, axis=-1, keepdims=True)
        var = jnp.mean((x - mu) ** 2, axis=-1, keepdims=True)
        return (x - mu) * jax.lax.rsqrt(var + EPS) * g + b

    # -- kernel 1: packed per-head projected value slab, stored head-major (M*L_pad, D) --
    def value_kernel(src_ref, wvp_ref, bvp_ref, vp_ref):
        # one lane-dense matmul for all heads: (L, D) @ (D, M*D)
        res = jnp.dot(src_ref[0].astype(cdt), wvp_ref[...],
                      preferred_element_type=jnp.float32) + bvp_ref[...]      # (L, M*D)
        for m in range(M):
            r0 = m * L_pad
            vp_ref[0, r0:r0 + L, :] = res[:, m * D:(m + 1) * D].astype(vp_ref.dtype)
            if L_pad > L:
                vp_ref[0, r0 + L:r0 + L_pad, :] = jnp.zeros((L_pad - L, D), vp_ref.dtype)

    # -- kernel 2: fused MSDeformAttn + residual/LN + FFN + residual/LN over a query tile --
    def layer_kernel(src_ref, pos_ref, refpix_ref, colmap_ref, vp_ref,
                     wproj_ref, bproj_ref, bout_ref, ln1g_ref, ln1b_ref,
                     w1_ref, b1_ref, w2_ref, b2_ref, ln2g_ref, ln2b_ref,
                     out_ref):
        src = src_ref[0]                                   # (TQ, D) f32
        q = (src + pos_ref[0]).astype(cdt)                 # with_pos_embed

        # fused sampling-offset-x / sampling-offset-y / attention-logit projection
        proj = jnp.dot(q, wproj_ref[...], preferred_element_type=jnp.float32) + bproj_ref[...]
        off_x = proj[:, 0:MLvP]                            # (TQ, M*Lv*P)
        off_y = proj[:, MLvP:2 * MLvP]
        logits = proj[:, 2 * MLvP:3 * MLvP]

        # one stable exp pass over all heads (per-head softmax is shift invariant)
        e = jnp.exp(logits - jnp.max(logits, axis=-1, keepdims=True))

        refpix = refpix_ref[0]                             # (TQ, 2*Lv*P)
        base_x = refpix[:, :LvP]                           # pixel-space ref (x*W - 0.5)
        base_y = refpix[:, LvP:]

        # precomputed per-level column coordinate maps (resident input, no in-kernel iota/div)
        cmap = colmap_ref[...]                             # (2*Lv, L_pad)
        col_x = [cmap[l:l + 1, :] for l in range(Lv)]
        col_y = [cmap[Lv + l:Lv + l + 1, :] for l in range(Lv)]

        # per-head weighted bilinear "tent" sampling matrices (lane-dense, 128-padded axis)
        s_blocks = []
        for m in range(M):
            sl = slice(m * LvP, (m + 1) * LvP)
            em = e[:, sl]
            den = jnp.sum(em, axis=-1, keepdims=True)
            if exact:
                attn = em / den
            else:
                attn = em * pl.reciprocal(den, approx=True)          # EUP, off the VALU
            xs = jnp.clip(base_x + off_x[:, sl], -COORD_CLIP, COORD_CLIP)
            ys = jnp.clip(base_y + off_y[:, sl], -COORD_CLIP, COORD_CLIP)
            S = jnp.zeros((TQ, L_pad), jnp.float32)
            for k in range(LvP):                                     # k = level*P + point
                lvl = k // P
                wx = jnp.maximum(1.0 - jnp.abs(col_x[lvl] - xs[:, k:k + 1]), 0.0)
                wy = jnp.maximum(1.0 - jnp.abs(col_y[lvl] - ys[:, k:k + 1]), 0.0)
                S = S + (wx * wy) * attn[:, k:k + 1]
            s_blocks.append(S)

        # single sampling matmul over all heads: K = M*L_pad (output proj folded into vp)
        S_all = jnp.concatenate(s_blocks, axis=1)                    # (TQ, M*L_pad)
        acc = jnp.dot(S_all.astype(cdt), vp_ref[0],
                      preferred_element_type=jnp.float32)            # (TQ, D)

        # residual + LayerNorm 1 (f32)
        x = src + acc + bout_ref[...]
        x = layernorm(x, ln1g_ref[...], ln1b_ref[...])
        # FFN + residual + LayerNorm 2
        h = jnp.dot(x.astype(cdt), w1_ref[...], preferred_element_type=jnp.float32) + b1_ref[...]
        h = jnp.maximum(h, 0.0)
        y = jnp.dot(h.astype(cdt), w2_ref[...], preferred_element_type=jnp.float32) + b2_ref[...]
        x = x + y
        x = layernorm(x, ln2g_ref[...], ln2b_ref[...])
        out_ref[0] = x.astype(out_ref.dtype)

    return value_kernel, layer_kernel, L, L_pad


# ---------------------------------------------------------------------------
# Wrapper-side weight re-layout (once per layer, plain JAX, outside the kernels)
# ---------------------------------------------------------------------------
def _prep_layer_params(lp, D, M, cdt):
    Dh = D // M
    woff, boff = lp["woff"], lp["boff"]
    # split offset columns into x / y blocks and fuse with the attention projection
    wproj = jnp.concatenate([woff[:, 0::2], woff[:, 1::2], lp["wattn"]], axis=1)
    bproj = jnp.concatenate([boff[:, 0::2], boff[:, 1::2], lp["battn"]], axis=1)
    # fold value_proj and output_proj per head, packed lane-dense: (D, M*D) / (1, M*D)
    wv, bv, wout = lp["wv"], lp["bv"], lp["wout"]
    wvp = jnp.concatenate([wv[:, m * Dh:(m + 1) * Dh] @ wout[m * Dh:(m + 1) * Dh, :]
                           for m in range(M)], axis=1)                   # (D, M*D)
    bvp = jnp.concatenate([bv[:, m * Dh:(m + 1) * Dh] @ wout[m * Dh:(m + 1) * Dh, :]
                           for m in range(M)], axis=1)                   # (1, M*D)
    return dict(
        wvp=wvp.astype(cdt), bvp=bvp,
        wproj=wproj.astype(cdt), bproj=bproj,
        bout=lp["bout"], ln1g=lp["ln1g"], ln1b=lp["ln1b"],
        w1=lp["w1"].astype(cdt), b1=lp["b1"],
        w2=lp["w2"].astype(cdt), b2=lp["b2"],
        ln2g=lp["ln2g"], ln2b=lp["ln2b"])


MAIN_WEIGHT_KEYS = ("wproj", "bproj", "bout", "ln1g", "ln1b",
                    "w1", "b1", "w2", "b2", "ln2g", "ln2b")


# ---------------------------------------------------------------------------
# Encoder wrapper: loops over layers, two pallas_calls per layer
# ---------------------------------------------------------------------------
def encoder_forward(src, pos, reference_points, params, spatial_shapes, M, P,
                    tq=None, matmul_dtype=jnp.bfloat16):
    B, L, D = src.shape
    Lv = len(spatial_shapes)
    LvP = Lv * P
    assert D % M == 0
    cdt = matmul_dtype
    if tq is None:
        tq = L                      # largest query tile -> grid (B, 1), minimal step overhead
    assert L % tq == 0 and tq % 8 == 0
    NQ = L // tq

    value_kernel, layer_kernel, L_k, L_pad = make_layer_kernels(
        spatial_shapes, D, M, P, tq, cdt)
    assert L_k == L

    ref_pix = make_ref_pix(reference_points, spatial_shapes, P)   # (B, L, 2*Lv*P)
    col_maps = make_col_maps(spatial_shapes, L_pad)               # (2*Lv, L_pad), grid-invariant
    prepped = [_prep_layer_params(lp, D, M, cdt) for lp in params]

    # Real footprint here is <1 MiB; 32 MiB leaves headroom on v7x (64 MiB physical VMEM).
    vmem_limit = 32 * 1024 * 1024
    cparams_layer = pltpu.CompilerParams(
        dimension_semantics=("parallel", "parallel"), vmem_limit_bytes=vmem_limit)
    cparams_value = pltpu.CompilerParams(
        dimension_semantics=("parallel",), vmem_limit_bytes=vmem_limit)

    def _wspec_layer(arr):
        zeros = (0,) * arr.ndim
        return pl.BlockSpec(arr.shape, lambda b, q: zeros)

    def layer_call(x, lp):
        # 1) packed per-head projected value slab, head-major rows (B, M*L_pad, D)
        vp = pl.pallas_call(
            value_kernel,
            out_shape=jax.ShapeDtypeStruct((B, M * L_pad, D), cdt),
            grid=(B,),
            in_specs=[
                pl.BlockSpec((1, L, D), lambda b: (b, 0, 0)),
                pl.BlockSpec((D, M * D), lambda b: (0, 0)),
                pl.BlockSpec((1, M * D), lambda b: (0, 0)),
            ],
            out_specs=pl.BlockSpec((1, M * L_pad, D), lambda b: (b, 0, 0)),
            compiler_params=cparams_value,
        )(x, lp["wvp"], lp["bvp"])

        weights = [lp[k] for k in MAIN_WEIGHT_KEYS]
        # 2) fused encoder layer over query tiles; vp / col_maps / weights resident across q
        return pl.pallas_call(
            layer_kernel,
            out_shape=jax.ShapeDtypeStruct((B, L, D), jnp.float32),
            grid=(B, NQ),
            in_specs=[
                pl.BlockSpec((1, tq, D), lambda b, q: (b, q, 0)),
                pl.BlockSpec((1, tq, D), lambda b, q: (b, q, 0)),
                pl.BlockSpec((1, tq, 2 * LvP), lambda b, q: (b, q, 0)),
                pl.BlockSpec((2 * Lv, L_pad), lambda b, q: (0, 0)),
                pl.BlockSpec((1, M * L_pad, D), lambda b, q: (b, 0, 0)),
            ] + [_wspec_layer(w) for w in weights],
            out_specs=pl.BlockSpec((1, tq, D), lambda b, q: (b, q, 0)),
            compiler_params=cparams_layer,
        )(x, pos, ref_pix, col_maps, vp, *weights)

    out = src
    for lp in prepped:
        out = layer_call(out, lp)
    return out


# ---------------------------------------------------------------------------
# Deterministic parameter init (synthetic weights, shapes from the module __init__)
# ---------------------------------------------------------------------------
def init_params(key, num_layers, D, M, Lv, P, Dffn):
    def lin(k, fan_in, fan_out, scale=None):
        if scale is None:
            scale = 1.0 / math.sqrt(fan_in)
        kw, kb = jax.random.split(k)
        w = jax.random.uniform(kw, (fan_in, fan_out), jnp.float32, -scale, scale)
        b = jax.random.uniform(kb, (1, fan_out), jnp.float32, -scale, scale)
        return w, b

    params = []
    for lk in jax.random.split(key, num_layers):
        ks = jax.random.split(lk, 6)
        wv, bv = lin(ks[0], D, D)
        woff, boff = lin(ks[1], D, M * Lv * P * 2, scale=0.1 / math.sqrt(D))
        wattn, battn = lin(ks[2], D, M * Lv * P)
        wout, bout = lin(ks[3], D, D)
        w1, b1 = lin(ks[4], D, Dffn)
        w2, b2 = lin(ks[5], Dffn, D)
        params.append(dict(
            wv=wv, bv=bv, woff=woff, boff=boff, wattn=wattn, battn=battn,
            wout=wout, bout=bout,
            ln1g=jnp.ones((1, D), jnp.float32), ln1b=jnp.zeros((1, D), jnp.float32),
            w1=w1, b1=b1, w2=w2, b2=b2,
            ln2g=jnp.ones((1, D), jnp.float32), ln2b=jnp.zeros((1, D), jnp.float32)))
    return params


# ---------------------------------------------------------------------------
# Pure-JAX reference (PyTorch-faithful math: 4-corner bilinear gather, unfused heads)
# ---------------------------------------------------------------------------
def _layernorm_ref(x, g, b):
    mu = jnp.mean(x, axis=-1, keepdims=True)
    var = jnp.mean((x - mu) ** 2, axis=-1, keepdims=True)
    return (x - mu) * jax.lax.rsqrt(var + 1e-5) * g + b


def layer_ref(x, pos, ref_pts, lp, spatial_shapes, M, P):
    B, L, D = x.shape
    Lv = len(spatial_shapes)
    Dh = D // M
    q = x + pos
    value = x @ lp["wv"] + lp["bv"]
    off = (q @ lp["woff"] + lp["boff"]).reshape(B, L, M, Lv, P, 2)
    attn = jax.nn.softmax((q @ lp["wattn"] + lp["battn"]).reshape(B, L, M, Lv * P), -1)
    attn = attn.reshape(B, L, M, Lv, P)
    val = value.reshape(B, L, M, Dh)

    out = jnp.zeros((B, L, M, Dh), jnp.float32)
    start = 0
    for l, (H, W) in enumerate(spatial_shapes):
        HW = H * W
        v_l = val[:, start:start + HW]                      # (B, HW, M, Dh)
        norm = jnp.array([W, H], jnp.float32)
        loc = ref_pts[:, :, None, l, None, :] + off[:, :, :, l, :, :] / norm  # (B,L,M,P,2)
        xp = loc[..., 0] * W - 0.5
        yp = loc[..., 1] * H - 0.5
        x0 = jnp.floor(xp)
        y0 = jnp.floor(yp)
        fx = xp - x0
        fy = yp - y0
        x0i = x0.astype(jnp.int32)
        y0i = y0.astype(jnp.int32)
        samp = jnp.zeros((B, L, M, P, Dh), jnp.float32)
        for (dy, dx, w) in ((0, 0, (1 - fy) * (1 - fx)), (0, 1, (1 - fy) * fx),
                            (1, 0, fy * (1 - fx)), (1, 1, fy * fx)):
            xi = x0i + dx
            yi = y0i + dy
            valid = ((xi >= 0) & (xi < W) & (yi >= 0) & (yi < H)).astype(jnp.float32)
            idx = yi * W + xi
            onehot = (idx[..., None] == jnp.arange(HW)).astype(jnp.float32)
            samp = samp + jnp.einsum("blmps,bsmd->blmpd", onehot * (w * valid)[..., None], v_l)
        out = out + (samp * attn[:, :, :, l, :, None]).sum(3)
        start += HW

    attn_out = out.reshape(B, L, D) @ lp["wout"] + lp["bout"]
    x = x + attn_out
    x = _layernorm_ref(x, lp["ln1g"], lp["ln1b"])
    h = jnp.maximum(x @ lp["w1"] + lp["b1"], 0.0)
    x = x + (h @ lp["w2"] + lp["b2"])
    x = _layernorm_ref(x, lp["ln2g"], lp["ln2b"])
    return x


def encoder_ref(src, pos, ref_pts, params, spatial_shapes, M, P):
    out = src
    for lp in params:
        out = layer_ref(out, pos, ref_pts, lp, spatial_shapes, M, P)
    return out


# ---------------------------------------------------------------------------
if __name__ == "__main__":
    B = 2
    D = 32          # d_model
    M = 4           # n_heads
    P = 4           # n_points
    Dffn = 64       # d_ffn
    num_layers = 2
    spatial_shapes = ((8, 8), (4, 4))
    Lv = len(spatial_shapes)
    L = sum(h * w for h, w in spatial_shapes)

    key = jax.random.PRNGKey(0)
    k_src, k_pos, k_par = jax.random.split(key, 3)
    src = jax.random.normal(k_src, (B, L, D), jnp.float32)
    pos = jax.random.normal(k_pos, (B, L, D), jnp.float32) * 0.1
    valid_ratios = jnp.ones((B, Lv, 2), jnp.float32)      # padding_mask=None
    params = init_params(k_par, num_layers, D, M, Lv, P, Dffn)

    reference_points = get_reference_points(spatial_shapes, valid_ratios)   # (B, L, Lv, 2)

    ref = encoder_ref(src, pos, reference_points, params, spatial_shapes, M, P)

    # exact-math path (f32 MXU operands): tight check of the fused/tent/folded implementation
    out_f32 = jax.block_until_ready(encoder_forward(
        src, pos, reference_points, params, spatial_shapes, M, P,
        matmul_dtype=jnp.float32))
    assert out_f32.shape == (B, L, D)
    assert bool(jnp.all(jnp.isfinite(out_f32)))
    err_f32 = float(jnp.max(jnp.abs(out_f32 - ref)))
    assert err_f32 < 5e-3, f"f32 kernel mismatch vs reference: {err_f32}"

    # perf path (bf16 MXU operands, f32 accumulation): dtype-tolerance check
    out_bf16 = jax.block_until_ready(encoder_forward(
        src, pos, reference_points, params, spatial_shapes, M, P,
        matmul_dtype=jnp.bfloat16))
    assert bool(jnp.all(jnp.isfinite(out_bf16)))
    err_bf16 = float(jnp.max(jnp.abs(out_bf16 - ref)))
    assert err_bf16 < 5e-2, f"bf16 kernel mismatch vs reference: {err_bf16}"

    print("KERNEL_OK")
</pallas_src>

<mosaic_0001>
module attributes {stable_mosaic.version = 11 : i64} {
  func.func @value_kernel(%arg0: i32, %arg1: memref<1x80x32xf32, #tpu.memory_space<vmem>>, %arg2: memref<32x128xf32, #tpu.memory_space<vmem>>, %arg3: memref<1x128xf32, #tpu.memory_space<vmem>>, %arg4: memref<1x512x32xf32, #tpu.memory_space<vmem>>) attributes {dimension_semantics = [#tpu.dimension_semantics<parallel>], iteration_bounds = array<i64: 2>, scalar_prefetch = 0 : i64, scratch_operands = 0 : i64, tpu.core_type = #tpu.core_type<tc>, window_params = [{transform_indices = @transform_0, window_bounds = array<i64: 1, 80, 32>}, {pipeline_mode = #tpu.pipeline_mode<synchronous>, transform_indices = @transform_1, window_bounds = array<i64: 32, 128>}, {pipeline_mode = #tpu.pipeline_mode<synchronous>, transform_indices = @transform_2, window_bounds = array<i64: 1, 128>}, {transform_indices = @transform_3, window_bounds = array<i64: 1, 512, 32>}]} {
    %c0 = arith.constant 0 : index
    %c0_0 = arith.constant 0 : index
    %c0_1 = arith.constant 0 : index
    %0 = vector.load %arg1[%c0, %c0_0, %c0_1] : memref<1x80x32xf32, #tpu.memory_space<vmem>>, vector<1x80x32xf32>
    %1 = vector.shape_cast %0 : vector<1x80x32xf32> to vector<80x32xf32>
    %c0_2 = arith.constant 0 : index
    %c0_3 = arith.constant 0 : index
    %2 = vector.load %arg2[%c0_2, %c0_3] : memref<32x128xf32, #tpu.memory_space<vmem>>, vector<32x128xf32>
    %cst = arith.constant dense<0.000000e+00> : vector<80x128xf32>
    %3 = tpu.matmul %1, %2, %cst {dimension_numbers = #tpu.dot_dimension_numbers<[1], [0], [0], [1], [0, 0, 1, 1], [], []>} : vector<80x32xf32>, vector<32x128xf32>, vector<80x128xf32> -> vector<80x128xf32>
    %c0_4 = arith.constant 0 : index
    %c0_5 = arith.constant 0 : index
    %4 = vector.load %arg3[%c0_4, %c0_5] : memref<1x128xf32, #tpu.memory_space<vmem>>, vector<1x128xf32>
    %5 = vector.broadcast %4 : vector<1x128xf32> to vector<80x128xf32>
    %6 = arith.addf %3, %5 : vector<80x128xf32>
    %7 = vector.extract_strided_slice %6 {offsets = [0, 0], sizes = [80, 32], strides = [1, 1]} : vector<80x128xf32> to vector<80x32xf32>
    %c0_6 = arith.constant 0 : index
    %c0_7 = arith.constant 0 : index
    %c0_8 = arith.constant 0 : index
    %8 = vector.load %arg4[%c0_6, %c0_7, %c0_8] : memref<1x512x32xf32, #tpu.memory_space<vmem>>, vector<1x80x32xf32>
    %9 = vector.shape_cast %8 : vector<1x80x32xf32> to vector<80x32xf32>
    %10 = vector.shape_cast %7 : vector<80x32xf32> to vector<1x80x32xf32>
    tpu.vector_store %arg4[%c0_6, %c0_7, %c0_8], %10 {strides = array<i32>} : memref<1x512x32xf32, #tpu.memory_space<vmem>>, vector<1x80x32xf32>,
    %cst_9 = arith.constant 0.000000e+00 : f32
    %11 = vector.broadcast %cst_9 : f32 to vector<48x32xf32>
    %c0_10 = arith.constant 0 : index
    %c80 = arith.constant 80 : index
    %c0_11 = arith.constant 0 : index
    %12 = vector.load %arg4[%c0_10, %c80, %c0_11] : memref<1x512x32xf32, #tpu.memory_space<vmem>>, vector<1x48x32xf32>
    %13 = vector.shape_cast %12 : vector<1x48x32xf32> to vector<48x32xf32>
    %14 = vector.shape_cast %11 : vector<48x32xf32> to vector<1x48x32xf32>
    tpu.vector_store %arg4[%c0_10, %c80, %c0_11], %14 {strides = array<i32>} : memref<1x512x32xf32, #tpu.memory_space<vmem>>, vector<1x48x32xf32>,
    %15 = vector.extract_strided_slice %6 {offsets = [0, 32], sizes = [80, 32], strides = [1, 1]} : vector<80x128xf32> to vector<80x32xf32>
    %c0_12 = arith.constant 0 : index
    %c128 = arith.constant 128 : index
    %c0_13 = arith.constant 0 : index
    %16 = vector.load %arg4[%c0_12, %c128, %c0_13] : memref<1x512x32xf32, #tpu.memory_space<vmem>>, vector<1x80x32xf32>
    %17 = vector.shape_cast %16 : vector<1x80x32xf32> to vector<80x32xf32>
    %18 = vector.shape_cast %15 : vector<80x32xf32> to vector<1x80x32xf32>
    tpu.vector_store %arg4[%c0_12, %c128, %c0_13], %18 {strides = array<i32>} : memref<1x512x32xf32, #tpu.memory_space<vmem>>, vector<1x80x32xf32>,
    %cst_14 = arith.constant 0.000000e+00 : f32
    %19 = vector.broadcast %cst_14 : f32 to vector<48x32xf32>
    %c0_15 = arith.constant 0 : index
    %c208 = arith.constant 208 : index
    %c0_16 = arith.constant 0 : index
    %20 = vector.load %arg4[%c0_15, %c208, %c0_16] : memref<1x512x32xf32, #tpu.memory_space<vmem>>, vector<1x48x32xf32>
    %21 = vector.shape_cast %20 : vector<1x48x32xf32> to vector<48x32xf32>
    %22 = vector.shape_cast %19 : vector<48x32xf32> to vector<1x48x32xf32>
    tpu.vector_store %arg4[%c0_15, %c208, %c0_16], %22 {strides = array<i32>} : memref<1x512x32xf32, #tpu.memory_space<vmem>>, vector<1x48x32xf32>,
    %23 = vector.extract_strided_slice %6 {offsets = [0, 64], sizes = [80, 32], strides = [1, 1]} : vector<80x128xf32> to vector<80x32xf32>
    %c0_17 = arith.constant 0 : index
    %c256 = arith.constant 256 : index
    %c0_18 = arith.constant 0 : index
    %24 = vector.load %arg4[%c0_17, %c256, %c0_18] : memref<1x512x32xf32, #tpu.memory_space<vmem>>, vector<1x80x32xf32>
    %25 = vector.shape_cast %24 : vector<1x80x32xf32> to vector<80x32xf32>
    %26 = vector.shape_cast %23 : vector<80x32xf32> to vector<1x80x32xf32>
    tpu.vector_store %arg4[%c0_17, %c256, %c0_18], %26 {strides = array<i32>} : memref<1x512x32xf32, #tpu.memory_space<vmem>>, vector<1x80x32xf32>,
    %cst_19 = arith.constant 0.000000e+00 : f32
    %27 = vector.broadcast %cst_19 : f32 to vector<48x32xf32>
    %c0_20 = arith.constant 0 : index
    %c336 = arith.constant 336 : index
    %c0_21 = arith.constant 0 : index
    %28 = vector.load %arg4[%c0_20, %c336, %c0_21] : memref<1x512x32xf32, #tpu.memory_space<vmem>>, vector<1x48x32xf32>
    %29 = vector.shape_cast %28 : vector<1x48x32xf32> to vector<48x32xf32>
    %30 = vector.shape_cast %27 : vector<48x32xf32> to vector<1x48x32xf32>
    tpu.vector_store %arg4[%c0_20, %c336, %c0_21], %30 {strides = array<i32>} : memref<1x512x32xf32, #tpu.memory_space<vmem>>, vector<1x48x32xf32>,
    %31 = vector.extract_strided_slice %6 {offsets = [0, 96], sizes = [80, 32], strides = [1, 1]} : vector<80x128xf32> to vector<80x32xf32>
    %c0_22 = arith.constant 0 : index
    %c384 = arith.constant 384 : index
    %c0_23 = arith.constant 0 : index
    %32 = vector.load %arg4[%c0_22, %c384, %c0_23] : memref<1x512x32xf32, #tpu.memory_space<vmem>>, vector<1x80x32xf32>
    %33 = vector.shape_cast %32 : vector<1x80x32xf32> to vector<80x32xf32>
    %34 = vector.shape_cast %31 : vector<80x32xf32> to vector<1x80x32xf32>
    tpu.vector_store %arg4[%c0_22, %c384, %c0_23], %34 {strides = array<i32>} : memref<1x512x32xf32, #tpu.memory_space<vmem>>, vector<1x80x32xf32>,
    %cst_24 = arith.constant 0.000000e+00 : f32
    %35 = vector.broadcast %cst_24 : f32 to vector<48x32xf32>
    %c0_25 = arith.constant 0 : index
    %c464 = arith.constant 464 : index
    %c0_26 = arith.constant 0 : index
    %36 = vector.load %arg4[%c0_25, %c464, %c0_26] : memref<1x512x32xf32, #tpu.memory_space<vmem>>, vector<1x48x32xf32>
    %37 = vector.shape_cast %36 : vector<1x48x32xf32> to vector<48x32xf32>
    %38 = vector.shape_cast %35 : vector<48x32xf32> to vector<1x48x32xf32>
    tpu.vector_store %arg4[%c0_25, %c464, %c0_26], %38 {strides = array<i32>} : memref<1x512x32xf32, #tpu.memory_space<vmem>>, vector<1x48x32xf32>,
    return
  }
  func.func @transform_0(%arg0: i32) -> (i32, i32, i32) {
    %c0_i32 = arith.constant 0 : i32
    %c0_i32_0 = arith.constant 0 : i32
    %c0_i32_1 = arith.constant 0 : i32
    return %arg0, %c0_i32, %c0_i32_0 : i32, i32, i32
  }
  func.func @transform_1(%arg0: i32) -> (i32, i32) {
    %c0_i32 = arith.constant 0 : i32
    %c0_i32_0 = arith.constant 0 : i32
    %c0_i32_1 = arith.constant 0 : i32
    return %c0_i32, %c0_i32_0 : i32, i32
  }
  func.func @transform_2(%arg0: i32) -> (i32, i32) {
    %c0_i32 = arith.constant 0 : i32
    %c0_i32_0 = arith.constant 0 : i32
    %c0_i32_1 = arith.constant 0 : i32
    return %c0_i32, %c0_i32_0 : i32, i32
  }
  func.func @transform_3(%arg0: i32) -> (i32, i32, i32) {
    %c0_i32 = arith.constant 0 : i32
    %c0_i32_0 = arith.constant 0 : i32
    %c0_i32_1 = arith.constant 0 : i32
    return %arg0, %c0_i32, %c0_i32_0 : i32, i32, i32
  }
}

</mosaic_0001>

<bundles_post_ra>
// kernel: tpu_custom_call.1
= control target key start
LH: loop header
LB: loop body
LE: loop exit
PB: predicated region body
PF: predicated region fallthrough
CT: control target
= control target key end

     0   :  { %s669_s12 = smov 0   ;;  %s881_s0 = inlined_call_operand.vmem [shape: f32[2,80,32], index: 0, kind: input, shape index: {}]   ;;  %s882_s1 = inlined_call_operand.vmem [shape: f32[32,128], index: 1, kind: input, shape index: {}]   ;;  %s883_s2 = inlined_call_operand.vmem [shape: f32[1,128], index: 2, kind: input, shape index: {}]   ;;  %s884_s3 = inlined_call_operand.vmem [shape: f32[2,512,32], index: 3, kind: output, shape index: {}]  }
   0x1 LB: > { %s557_s13 = sadd.s32 4294967295, %s643_s12   ;;  %p561_p0 = scmp.ge.s32.totalorder %s643_s12, 1  ;;  %s643_s12 = sphi %s669_s12, %s13_s12  }
   0x2   : > { %p137_p1 = scmp.lt.s32.totalorder %s643_s12, 3 }
   0x4   : > { %p138_p2 = pnand %p561_p0, %p137_p1 }
   0x5   : > { %p161_p3 = scmp.lt.s32.totalorder (!%p138_p2), %s557_s13, 1  ;;  %s645_s5 = smov (!%p138_p2), 96  }
   0x6   : > { %141 = sbr.rel (%p138_p2) target bundleno = 388 (0x184), region = 32  ;;  %s646_s6 = smov (!%p138_p2), 64  }
   0x7   : > { %s647_s7 = smov (!%p138_p2), 32  }
   0xb   : > { %v184_v0 = vld [vmem:[%s882_s1 + $0x18] sm:$0xff]  ;;  %v183_v1 = vld [vmem:[%s882_s1 + $0x10] sm:$0xff]  ;;  %v182_v2 = vld [vmem:[%s882_s1 + $0x8] sm:$0xff]  ;;  %s886_s13 = smov (!%p161_p3, %s557_s13), 1  ;;  %vm192_vm0 = vcmask 261120   ;;  %v648_v35 = vmov 0.0  }
   0xc   : > { %593 = vmatprep.subr.mxu0 %v184_v0  ;;  %616 = vmatprep.subr.mxu1 %v184_v0  ;;  %v181_v3 = vld [vmem:[%s882_s1] sm:$0xff]  ;;  %s624_s22 = smul.u32 80, %s886_s13  ;;  %s578_s26 = sshll.u32 %s886_s13, 9 }
   0xd   : > { %594 = vmatpush3.msra.mxu0 %v184_v0  ;;  %620 = vmatpush3.msra.mxu1 %v184_v0  ;;  %v565_v14 = vld [vmem:[%s883_s2] ss:$0 sm:$0xff]  ;;  %s712_s4 = scalar_lea.vmem %s884_s3, %s578_s26 }
   0xe   : > { %595 = vmatprep.subr.mxu0 %v183_v1  ;;  %617 = vmatprep.subr.mxu1 %v183_v1  ;;  %s165_s25 = scalar_lea.vmem %s881_s0, %s624_s22  ;;  %348 = vst.msk [vmem:[%s712_s4 + $0x50] sm:$0xff] %vm192_vm0, %v648_v35  ;;  %349 = vst.msk [vmem:[%s712_s4 + $0x58] sm:$0xff] %vm192_vm0, %v648_v35 }
   0xf   : > { %596 = vmatpush3.msra.mxu0 %v183_v1  ;;  %621 = vmatpush3.msra.mxu1 %v183_v1  ;;  %v171_v4 = vld [vmem:[%s165_s25] sm:$0xff]  ;;  %v177_v5 = vld [vmem:[%s165_s25 + $0x30] sm:$0xff]  ;;  %v172_v6 = vld [vmem:[%s165_s25 + $0x8] sm:$0xff]  ;;  %350 = vst.msk [vmem:[%s712_s4 + $0x60] sm:$0xff] %vm192_vm0, %v648_v35 }
  0x10   : > { %597 = vmatprep.subr.mxu0 %v182_v2  ;;  %618 = vmatprep.subr.mxu1 %v182_v2  ;;  %v178_v7 = vld [vmem:[%s165_s25 + $0x38] sm:$0xff]  ;;  %v173_v8 = vld [vmem:[%s165_s25 + $0x10] sm:$0xff]  ;;  %v179_v9 = vld [vmem:[%s165_s25 + $0x40] sm:$0xff]  ;;  %351 = vst.msk [vmem:[%s712_s4 + $0x68] sm:$0xff] %vm192_vm0, %v648_v35 }
  0x11   : > { %598 = vmatpush3.msra.mxu0 %v182_v2  ;;  %622 = vmatpush3.msra.mxu1 %v182_v2  ;;  %v174_v10 = vld [vmem:[%s165_s25 + $0x18] sm:$0xff]  ;;  %v180_v11 = vld [vmem:[%s165_s25 + $0x48] sm:$0xff]  ;;  %v175_v12 = vld [vmem:[%s165_s25 + $0x20] sm:$0xff]  ;;  %352 = vst.msk [vmem:[%s712_s4 + $0x70] sm:$0xff] %vm192_vm0, %v648_v35 }
  0x12   : > { %599 = vmatprep.subr.mxu0 %v181_v3  ;;  %619 = vmatprep.subr.mxu1 %v181_v3  ;;  %v176_v13 = vld [vmem:[%s165_s25 + $0x28] sm:$0xff]  ;;  %353 = vst.msk [vmem:[%s712_s4 + $0x78] sm:$0xff] %vm192_vm0, %v648_v35  ;;  %404 = vst.msk [vmem:[%s712_s4 + $0xd0] sm:$0xff] %vm192_vm0, %v648_v35 }
  0x13   : > { %600 = vmatpush3.msra.mxu0 %v181_v3  ;;  %623 = vmatpush3.msra.mxu1 %v181_v3  ;;  %405 = vst.msk [vmem:[%s712_s4 + $0xd8] sm:$0xff] %vm192_vm0, %v648_v35  ;;  %406 = vst.msk [vmem:[%s712_s4 + $0xe0] sm:$0xff] %vm192_vm0, %v648_v35 }
  0x14   : > { %601 = vmatprep.mubr.msk.f32.mxu0 %vm192_vm0, %v171_v4  ;;  %610 = vmatprep.mubr.msk.f32.mxu1 %vm192_vm0, %v177_v5  ;;  %407 = vst.msk [vmem:[%s712_s4 + $0xe8] sm:$0xff] %vm192_vm0, %v648_v35  ;;  %408 = vst.msk [vmem:[%s712_s4 + $0xf0] sm:$0xff] %vm192_vm0, %v648_v35 }
  0x15   : > { %602 = vmatmul.mubr.msk.f32.vlgmr.msra.gmra.mxu0 %vm192_vm0, %v172_v6  ;;  %611 = vmatmul.mubr.msk.f32.vlgmr.msra.gmra.mxu1 %vm192_vm0, %v178_v7  ;;  %409 = vst.msk [vmem:[%s712_s4 + $0xf8] sm:$0xff] %vm192_vm0, %v648_v35  ;;  %450 = vst.msk [vmem:[%s712_s4 + $0x150] sm:$0xff] %vm192_vm0, %v648_v35 }
  0x16   : > { %604 = vmatprep.mubr.msk.f32.mxu0 %vm192_vm0, %v173_v8  ;;  %613 = vmatprep.mubr.msk.f32.mxu1 %vm192_vm0, %v179_v9  ;;  %451 = vst.msk [vmem:[%s712_s4 + $0x158] sm:$0xff] %vm192_vm0, %v648_v35  ;;  %452 = vst.msk [vmem:[%s712_s4 + $0x160] sm:$0xff] %vm192_vm0, %v648_v35 }
  0x17   : > { %453 = vst.msk [vmem:[%s712_s4 + $0x168] sm:$0xff] %vm192_vm0, %v648_v35  ;;  %454 = vst.msk [vmem:[%s712_s4 + $0x170] sm:$0xff] %vm192_vm0, %v648_v35 }
  0x18   : > { %455 = vst.msk [vmem:[%s712_s4 + $0x178] sm:$0xff] %vm192_vm0, %v648_v35  ;;  %496 = vst.msk [vmem:[%s712_s4 + $0x1d0] sm:$0xff] %vm192_vm0, %v648_v35 }
  0x19   : > { %605 = vmatmul.mubr.msk.f32.gmra.mxu0 %vm192_vm0, %v174_v10  ;;  %614 = vmatmul.mubr.msk.f32.gmra.mxu1 %vm192_vm0, %v180_v11  ;;  %497 = vst.msk [vmem:[%s712_s4 + $0x1d8] sm:$0xff] %vm192_vm0, %v648_v35  ;;  %498 = vst.msk [vmem:[%s712_s4 + $0x1e0] sm:$0xff] %vm192_vm0, %v648_v35 }
  0x1a   : > { %607 = vmatprep.mubr.msk.f32.mxu0 %vm192_vm0, %v175_v12  ;;  %499 = vst.msk [vmem:[%s712_s4 + $0x1e8] sm:$0xff] %vm192_vm0, %v648_v35  ;;  %500 = vst.msk [vmem:[%s712_s4 + $0x1f0] sm:$0xff] %vm192_vm0, %v648_v35 }
  0x1b   : > { %501 = vst.msk [vmem:[%s712_s4 + $0x1f8] sm:$0xff] %vm192_vm0, %v648_v35 }
  0x1d   : > { %608 = vmatmul.mubr.msk.f32.gmra.mxu0 %vm192_vm0, %v176_v13 }
  0xd5   : > { %v603_v15 = vpop.f32.mrf.mxu0  ;;  %v612_v16 = vpop.f32.mrf.mxu1 }
  0xd6   : > { %v295_v17 = vadd.f32 %v603_v15, %v565_v14  ;;  %v325_v18 = vadd.f32 %v612_v16, %v565_v14 }
  0xd7   : > { %v289_v19 = vpop.f32.mrf.mxu0  ;;  %v319_v20 = vpop.f32.mrf.mxu1 }
  0xd8   : > { %339 = vst.msk [vmem:[%s712_s4 + $0x8] sm:$0xff] %vm192_vm0, %v295_v17  ;;  %345 = vst.msk [vmem:[%s712_s4 + $0x38] sm:$0xff] %vm192_vm0, %v325_v18  ;;  %v290_v21 = vadd.f32 %v565_v14, %v289_v19  ;;  %v320_v22 = vadd.f32 %v565_v14, %v319_v20  ;;  %378 = vrot.lane.b32.xlu1 %v325_v18, %s645_s5  ;;  %366 = vrot.lane.b32.xlu0 %v295_v17, %s645_s5 }
  0xd9   : > { %v606_v23 = vpop.f32.mrf.mxu0  ;;  %v615_v24 = vpop.f32.mrf.mxu1 }
  0xda   : > { %338 = vst.msk [vmem:[%s712_s4] sm:$0xff] %vm192_vm0, %v290_v21  ;;  %344 = vst.msk [vmem:[%s712_s4 + $0x30] sm:$0xff] %vm192_vm0, %v320_v22  ;;  %v305_v25 = vadd.f32 %v606_v23, %v565_v14  ;;  %v724_v26 = vadd.f32 %v615_v24, %v565_v14 }
  0xdb   : > { %v299_v27 = vpop.f32.mrf.mxu0  ;;  %v329_v28 = vpop.f32.mrf.mxu1 }
  0xdc   : > { %412 = vrot.lane.b32.xlu1 %v295_v17, %s646_s6  ;;  %364 = vrot.lane.b32.xlu0 %v290_v21, %s645_s5  ;;  %341 = vst.msk [vmem:[%s712_s4 + $0x18] sm:$0xff] %vm192_vm0, %v305_v25  ;;  %v300_v29 = vadd.f32 %v565_v14, %v299_v27  ;;  %347 = vst.msk [vmem:[%s712_s4 + $0x48] sm:$0xff] %vm192_vm0, %v724_v26  ;;  %v330_v30 = vadd.f32 %v565_v14, %v329_v28 }
  0xdd   : > { %v609_v31 = vpop.f32.mrf.mxu0 }
  0xde   : > { %340 = vst.msk [vmem:[%s712_s4 + $0x10] sm:$0xff] %vm192_vm0, %v300_v29  ;;  %346 = vst.msk [vmem:[%s712_s4 + $0x40] sm:$0xff] %vm192_vm0, %v330_v30  ;;  %v315_v32 = vadd.f32 %v609_v31, %v565_v14 }
  0xdf   : > { %v309_v33 = vpop.f32.mrf.mxu0 }
  0xe0   : > { %424 = vrot.lane.b32.xlu1 %v325_v18, %s646_s6  ;;  %376 = vrot.lane.b32.xlu0 %v320_v22, %s645_s5  ;;  %343 = vst.msk [vmem:[%s712_s4 + $0x28] sm:$0xff] %vm192_vm0, %v315_v32  ;;  %v310_v34 = vadd.f32 %v565_v14, %v309_v33 }
  0xe2   : > { %342 = vst.msk [vmem:[%s712_s4 + $0x20] sm:$0xff] %vm192_vm0, %v310_v34 }
  0xe4   : > { %458 = vrot.lane.b32.xlu1 %v295_v17, %s647_s7  ;;  %410 = vrot.lane.b32.xlu0 %v290_v21, %s646_s6 }
  0xe8   : > { %470 = vrot.lane.b32.xlu1 %v325_v18, %s647_s7  ;;  %422 = vrot.lane.b32.xlu0 %v320_v22, %s646_s6 }
  0xec   : > { %370 = vrot.lane.b32.xlu1 %v305_v25, %s645_s5  ;;  %456 = vrot.lane.b32.xlu0 %v290_v21, %s647_s7 }
  0xf0   : > { %382 = vrot.lane.b32.xlu1 %v724_v26, %s645_s5  ;;  %468 = vrot.lane.b32.xlu0 %v320_v22, %s647_s7 }
  0xf4   : > { %416 = vrot.lane.b32.xlu1 %v305_v25, %s646_s6  ;;  %380 = vrot.lane.b32.xlu0 %v330_v30, %s645_s5 }
  0xf8   : > { %428 = vrot.lane.b32.xlu1 %v724_v26, %s646_s6  ;;  %414 = vrot.lane.b32.xlu0 %v300_v29, %s646_s6 }
  0xfc   : > { %462 = vrot.lane.b32.xlu1 %v305_v25, %s647_s7  ;;  %426 = vrot.lane.b32.xlu0 %v330_v30, %s646_s6 }
 0x100   : > { %368 = vrot.lane.b32.xlu1 %v300_v29, %s645_s5  ;;  %460 = vrot.lane.b32.xlu0 %v300_v29, %s647_s7 }
 0x104   : > { %374 = vrot.lane.b32.xlu1 %v315_v32, %s645_s5  ;;  %372 = vrot.lane.b32.xlu0 %v310_v34, %s645_s5 }
 0x108   : > { %420 = vrot.lane.b32.xlu1 %v315_v32, %s646_s6  ;;  %418 = vrot.lane.b32.xlu0 %v310_v34, %s646_s6 }
 0x10c   : > { %466 = vrot.lane.b32.xlu1 %v315_v32, %s647_s7  ;;  %464 = vrot.lane.b32.xlu0 %v310_v34, %s647_s7 }
 0x110   : > { %474 = vrot.lane.b32.xlu1 %v724_v26, %s647_s7  ;;  %472 = vrot.lane.b32.xlu0 %v330_v30, %s647_s7 }
 0x14a   : > { %v379_v36 = vpop.permute.xlu1 %378  ;;  %v367_v37 = vpop.permute.xlu0 %366 }
 0x14b   : > { %401 = vst.msk [vmem:[%s712_s4 + $0xb8] sm:$0xff] %vm192_vm0, %v379_v36  ;;  %395 = vst.msk [vmem:[%s712_s4 + $0x88] sm:$0xff] %vm192_vm0, %v367_v37 }
 0x14e   : > { %v413_v38 = vpop.permute.xlu1 %412  ;;  %v365_v39 = vpop.permute.xlu0 %364 }
 0x14f   : > { %441 = vst.msk [vmem:[%s712_s4 + $0x108] sm:$0xff] %vm192_vm0, %v413_v38  ;;  %394 = vst.msk [vmem:[%s712_s4 + $0x80] sm:$0xff] %vm192_vm0, %v365_v39 }
 0x152   : > { %v425_v40 = vpop.permute.xlu1 %424  ;;  %v377_v41 = vpop.permute.xlu0 %376 }
 0x153   : > { %447 = vst.msk [vmem:[%s712_s4 + $0x138] sm:$0xff] %vm192_vm0, %v425_v40  ;;  %400 = vst.msk [vmem:[%s712_s4 + $0xb0] sm:$0xff] %vm192_vm0, %v377_v41 }
 0x156   : > { %v459_v42 = vpop.permute.xlu1 %458  ;;  %v411_v43 = vpop.permute.xlu0 %410 }
 0x157   : > { %487 = vst.msk [vmem:[%s712_s4 + $0x188] sm:$0xff] %vm192_vm0, %v459_v42  ;;  %440 = vst.msk [vmem:[%s712_s4 + $0x100] sm:$0xff] %vm192_vm0, %v411_v43 }
 0x15a   : > { %v471_v44 = vpop.permute.xlu1 %470  ;;  %v423_v45 = vpop.permute.xlu0 %422 }
 0x15b   : > { %493 = vst.msk [vmem:[%s712_s4 + $0x1b8] sm:$0xff] %vm192_vm0, %v471_v44  ;;  %446 = vst.msk [vmem:[%s712_s4 + $0x130] sm:$0xff] %vm192_vm0, %v423_v45 }
 0x15e   : > { %v371_v46 = vpop.permute.xlu1 %370  ;;  %v457_v47 = vpop.permute.xlu0 %456 }
 0x15f   : > { %397 = vst.msk [vmem:[%s712_s4 + $0x98] sm:$0xff] %vm192_vm0, %v371_v46  ;;  %486 = vst.msk [vmem:[%s712_s4 + $0x180] sm:$0xff] %vm192_vm0, %v457_v47 }
 0x162   : > { %v383_v48 = vpop.permute.xlu1 %382  ;;  %v469_v49 = vpop.permute.xlu0 %468 }
 0x163   : > { %403 = vst.msk [vmem:[%s712_s4 + $0xc8] sm:$0xff] %vm192_vm0, %v383_v48  ;;  %492 = vst.msk [vmem:[%s712_s4 + $0x1b0] sm:$0xff] %vm192_vm0, %v469_v49 }
 0x166   : > { %v417_v50 = vpop.permute.xlu1 %416  ;;  %v381_v51 = vpop.permute.xlu0 %380 }
 0x167   : > { %443 = vst.msk [vmem:[%s712_s4 + $0x118] sm:$0xff] %vm192_vm0, %v417_v50  ;;  %402 = vst.msk [vmem:[%s712_s4 + $0xc0] sm:$0xff] %vm192_vm0, %v381_v51 }
 0x16a   : > { %v429_v52 = vpop.permute.xlu1 %428  ;;  %v415_v53 = vpop.permute.xlu0 %414 }
 0x16b   : > { %449 = vst.msk [vmem:[%s712_s4 + $0x148] sm:$0xff] %vm192_vm0, %v429_v52  ;;  %442 = vst.msk [vmem:[%s712_s4 + $0x110] sm:$0xff] %vm192_vm0, %v415_v53 }
 0x16e   : > { %v463_v54 = vpop.permute.xlu1 %462  ;;  %v427_v55 = vpop.permute.xlu0 %426 }
 0x16f   : > { %489 = vst.msk [vmem:[%s712_s4 + $0x198] sm:$0xff] %vm192_vm0, %v463_v54  ;;  %448 = vst.msk [vmem:[%s712_s4 + $0x140] sm:$0xff] %vm192_vm0, %v427_v55 }
 0x172   : > { %v369_v56 = vpop.permute.xlu1 %368  ;;  %v461_v57 = vpop.permute.xlu0 %460 }
 0x173   : > { %396 = vst.msk [vmem:[%s712_s4 + $0x90] sm:$0xff] %vm192_vm0, %v369_v56  ;;  %488 = vst.msk [vmem:[%s712_s4 + $0x190] sm:$0xff] %vm192_vm0, %v461_v57 }
 0x176   : > { %v375_v58 = vpop.permute.xlu1 %374  ;;  %v373_v59 = vpop.permute.xlu0 %372 }
 0x177   : > { %399 = vst.msk [vmem:[%s712_s4 + $0xa8] sm:$0xff] %vm192_vm0, %v375_v58  ;;  %398 = vst.msk [vmem:[%s712_s4 + $0xa0] sm:$0xff] %vm192_vm0, %v373_v59 }
 0x17a   : > { %v421_v60 = vpop.permute.xlu1 %420  ;;  %v419_v61 = vpop.permute.xlu0 %418 }
 0x17b   : > { %445 = vst.msk [vmem:[%s712_s4 + $0x128] sm:$0xff] %vm192_vm0, %v421_v60  ;;  %444 = vst.msk [vmem:[%s712_s4 + $0x120] sm:$0xff] %vm192_vm0, %v419_v61 }
 0x17e   : > { %v467_v62 = vpop.permute.xlu1 %466  ;;  %v465_v63 = vpop.permute.xlu0 %464 }
 0x17f   : > { %491 = vst.msk [vmem:[%s712_s4 + $0x1a8] sm:$0xff] %vm192_vm0, %v467_v62  ;;  %490 = vst.msk [vmem:[%s712_s4 + $0x1a0] sm:$0xff] %vm192_vm0, %v465_v63 }
 0x182   : > { %v475_v0 = vpop.permute.xlu1 %474  ;;  %v473_v1 = vpop.permute.xlu0 %472 }
 0x183   : > { %495 = vst.msk [vmem:[%s712_s4 + $0x1c8] sm:$0xff] %vm192_vm0, %v475_v0  ;;  %494 = vst.msk [vmem:[%s712_s4 + $0x1c0] sm:$0xff] %vm192_vm0, %v473_v1 }
 0x184 PF: > { %s13_s12 = sadd.s32 1, %s643_s12  }
 0x185   : > { %p10_p4 = scmp.ge.s32.totalorder %s13_s12, 4  }
 0x187   :  { %12 = sbr.rel (!%p10_p4) target bundleno = 1 (0x1), region = 62 }

</bundles_post_ra>
